<compile_context>
chip_gen: v5e
topology: v5e:2x2
jax: 0.10.0
libtpu: 0.0.40
codegen_flags: <defaults>
</compile_context>

<pallas_src>
import math

import jax
import jax.numpy as jnp
from jax.experimental import pallas as pl
from jax.experimental.pallas import tpu as pltpu

# Per-operand, per-block VMEM budget.  3 operands x 2 pipeline buffers x 1 MiB
# = 6 MiB, comfortably inside the default scoped VMEM on v5e/v6e/v7x while
# being far past the ~512-lane roofline knee.
_BLOCK_BUDGET_BYTES = 1 << 20


def _pick_hw_tile(hw, rows, itemsize, budget_bytes=_BLOCK_BUDGET_BYTES):
    """Pick a tile of the flattened-spatial axis.

    Returns either the full axis (always layout-legal) or the largest
    multiple-of-128 divisor of `hw` whose block (rows x tile) fits the budget.
    """
    full_bytes = rows * hw * itemsize
    if full_bytes <= budget_bytes or hw < 128:
        return hw
    max_elems = max(128, budget_bytes // max(1, rows * itemsize))
    t = (max_elems // 128) * 128
    while t >= 128:
        if hw % t == 0:
            return t
        t -= 128
    return hw  # no lane-aligned divisor; fall back to the full axis


# ----------------------------------------------------------------------------
# Kernel 1: mix the image batch.
# Input is (B, C, HW) with HW = prod(spatial) as the lane-dense last axis.
# The rolled view x[(i-1) % B] comes purely from the second BlockSpec's
# index_map, so no rolled copy is materialized in HBM.
# ----------------------------------------------------------------------------
def _batch_mix_kernel(lam_ref, x_ref, x_rolled_ref, out_ref):
    lam = lam_ref[0]
    one_minus_lam = lam_ref[1]
    out_ref[...] = lam * x_ref[...] + one_minus_lam * x_rolled_ref[...]


def mixup_batch_flat(x_flat, lam2):
    """x_flat: (B, C, HW) float; lam2: (2,) float32 = [lam, 1-lam] in SMEM."""
    B, C, HW = x_flat.shape
    t_hw = _pick_hw_tile(HW, C, x_flat.dtype.itemsize)
    grid = (B, HW // t_hw)
    return pl.pallas_call(
        _batch_mix_kernel,
        out_shape=jax.ShapeDtypeStruct(x_flat.shape, x_flat.dtype),
        grid=grid,
        in_specs=[
            pl.BlockSpec(memory_space=pltpu.MemorySpace.SMEM),           # [lam, 1-lam]
            pl.BlockSpec((1, C, t_hw), lambda i, j: (i, 0, j)),           # x[i]
            pl.BlockSpec((1, C, t_hw),
                         lambda i, j: ((i + B - 1) % B, 0, j)),           # x[(i-1)%B]
        ],
        out_specs=pl.BlockSpec((1, C, t_hw), lambda i, j: (i, 0, j)),
        compiler_params=pltpu.CompilerParams(
            dimension_semantics=("parallel", "parallel")),
    )(lam2, x_flat, x_flat)


# ----------------------------------------------------------------------------
# Kernel 2: fused one-hot + mix for integer segmentation targets.
# labels: (B, 1, HW) int32  ->  output (B, num_classes, HW) in batch dtype.
# One-hot is one broadcasted iota compare; mix accumulates in f32 and casts
# on the single slab store (lane axis = HW).
# ----------------------------------------------------------------------------
def _target_mix_kernel(lam_ref, t_ref, t_rolled_ref, out_ref):
    lam = lam_ref[0]
    one_minus_lam = lam_ref[1]
    num_classes = out_ref.shape[1]
    t_hw = out_ref.shape[2]
    classes = jax.lax.broadcasted_iota(jnp.int32, (num_classes, t_hw), 0)
    oh = (classes == t_ref[0]).astype(jnp.float32)          # (num_classes, t_hw)
    ohr = (classes == t_rolled_ref[0]).astype(jnp.float32)  # (num_classes, t_hw)
    mixed = lam * oh + one_minus_lam * ohr                   # f32 accumulate
    out_ref[0] = mixed.astype(out_ref.dtype)


def mixup_target_flat(labels_flat, lam2, num_classes, out_dtype):
    """labels_flat: (B, 1, HW) int32; returns (B, num_classes, HW) out_dtype."""
    B, _, HW = labels_flat.shape
    t_hw = _pick_hw_tile(HW, num_classes, jnp.dtype(out_dtype).itemsize)
    grid = (B, HW // t_hw)
    return pl.pallas_call(
        _target_mix_kernel,
        out_shape=jax.ShapeDtypeStruct((B, num_classes, HW), out_dtype),
        grid=grid,
        in_specs=[
            pl.BlockSpec(memory_space=pltpu.MemorySpace.SMEM),           # [lam, 1-lam]
            pl.BlockSpec((1, 1, t_hw), lambda i, j: (i, 0, j)),           # t[i]
            pl.BlockSpec((1, 1, t_hw),
                         lambda i, j: ((i + B - 1) % B, 0, j)),           # t[(i-1)%B]
        ],
        out_specs=pl.BlockSpec((1, num_classes, t_hw), lambda i, j: (i, 0, j)),
        compiler_params=pltpu.CompilerParams(
            dimension_semantics=("parallel", "parallel")),
    )(lam2, labels_flat, labels_flat)


# ----------------------------------------------------------------------------
# Python wrapper mirroring RandomMixUp.forward (works for 4-D and 5-D inputs).
# ----------------------------------------------------------------------------
def random_mixup(batch, possibly_targets, *, num_classes, alpha=1.0, key=None):
    was_list = isinstance(possibly_targets, (list, tuple))
    targets = list(possibly_targets) if was_list else [possibly_targets]

    B, C = batch.shape[0], batch.shape[1]
    hw = math.prod(batch.shape[2:])

    # lambda ~ Beta(alpha, alpha)  (== Dirichlet([alpha, alpha])[0])
    lam = jax.random.beta(key, alpha, alpha).astype(jnp.float32)
    lam2 = jnp.stack([lam, 1.0 - lam])  # [lam, 1 - lam] -> SMEM

    mixed_batch = mixup_batch_flat(
        batch.reshape(B, C, hw), lam2).reshape(batch.shape)

    mixed_targets = []
    for target in targets:
        if num_classes != target.shape[1]:
            # Integer label map with a singleton channel -> fused one-hot + mix.
            t_hw = math.prod(target.shape[2:])
            labels_flat = target.astype(jnp.int32).reshape(B, 1, t_hw)
            mixed = mixup_target_flat(labels_flat, lam2, num_classes,
                                      batch.dtype)
            mixed = mixed.reshape((B, num_classes) + target.shape[2:])
        else:
            # Already per-class encoded: mix directly like the batch.
            ct = target.shape[1]
            t_hw = math.prod(target.shape[2:])
            t_flat = target.astype(batch.dtype).reshape(B, ct, t_hw)
            mixed = mixup_batch_flat(t_flat, lam2).reshape(
                (B, ct) + target.shape[2:])
        mixed_targets.append(mixed)

    if was_list:
        return mixed_batch, mixed_targets
    return mixed_batch, mixed_targets[0]


# ----------------------------------------------------------------------------
# Pure-JAX reference for verification.
# ----------------------------------------------------------------------------
def _reference(batch, target_labels, lam, num_classes):
    br = jnp.roll(batch, 1, axis=0)
    mixed_b = lam * batch + (1.0 - lam) * br
    oh = jax.nn.one_hot(target_labels, num_classes, dtype=jnp.float32)  # (B,H,W,NC)
    oh = jnp.transpose(oh, (0, 3, 1, 2))                                 # (B,NC,H,W)
    ohr = jnp.roll(oh, 1, axis=0)
    mixed_t = (lam * oh + (1.0 - lam) * ohr).astype(batch.dtype)
    return mixed_b, mixed_t


if __name__ == "__main__":
    B, C, H, W = 2, 4, 16, 16
    NUM_CLASSES = 4
    ALPHA = 1.0

    key = jax.random.PRNGKey(0)
    k_batch, k_target, k_lam = jax.random.split(key, 3)

    batch = jax.random.normal(k_batch, (B, C, H, W), dtype=jnp.float32)
    # Integer segmentation-style target with a singleton channel dim (B, 1, H, W),
    # which triggers the one-hot branch (num_classes != target.shape[1]).
    target = jax.random.randint(k_target, (B, 1, H, W), 0, NUM_CLASSES,
                                dtype=jnp.int32)

    mixed_batch, mixed_target = random_mixup(
        batch, target, num_classes=NUM_CLASSES, alpha=ALPHA, key=k_lam)
    mixed_batch = jax.block_until_ready(mixed_batch)
    mixed_target = jax.block_until_ready(mixed_target)

    # Verify against a pure-JAX reference with the same lambda draw.
    lam = jax.random.beta(k_lam, ALPHA, ALPHA).astype(jnp.float32)
    ref_b, ref_t = _reference(batch, jnp.squeeze(target, axis=1), lam,
                              NUM_CLASSES)
    assert mixed_batch.shape == (B, C, H, W)
    assert mixed_target.shape == (B, NUM_CLASSES, H, W)
    assert jnp.allclose(mixed_batch, ref_b, atol=1e-6)
    assert jnp.allclose(mixed_target, ref_t, atol=1e-6)

    print("KERNEL_OK")
</pallas_src>

<mosaic_0001>
module attributes {stable_mosaic.version = 11 : i64} {
  func.func @_batch_mix_kernel(%arg0: i32, %arg1: i32, %arg2: memref<2xf32, #tpu.memory_space<smem>>, %arg3: memref<1x4x256xf32, #tpu.memory_space<vmem>>, %arg4: memref<1x4x256xf32, #tpu.memory_space<vmem>>, %arg5: memref<1x4x256xf32, #tpu.memory_space<vmem>>) attributes {dimension_semantics = [#tpu.dimension_semantics<parallel>, #tpu.dimension_semantics<parallel>], iteration_bounds = array<i64: 2, 1>, scalar_prefetch = 0 : i64, scratch_operands = 0 : i64, tpu.core_type = #tpu.core_type<tc>, window_params = [{transform_indices = @transform_0, window_bounds = array<i64: 2>}, {transform_indices = @transform_1, window_bounds = array<i64: 1, 4, 256>}, {transform_indices = @transform_2, window_bounds = array<i64: 1, 4, 256>}, {transform_indices = @transform_3, window_bounds = array<i64: 1, 4, 256>}]} {
    %c0 = arith.constant 0 : index
    %0 = memref.load %arg2[%c0] : memref<2xf32, #tpu.memory_space<smem>>
    %c1 = arith.constant 1 : index
    %1 = memref.load %arg2[%c1] : memref<2xf32, #tpu.memory_space<smem>>
    %c0_0 = arith.constant 0 : index
    %c0_1 = arith.constant 0 : index
    %c0_2 = arith.constant 0 : index
    %2 = vector.load %arg3[%c0_0, %c0_1, %c0_2] : memref<1x4x256xf32, #tpu.memory_space<vmem>>, vector<1x4x256xf32>
    %3 = vector.broadcast %0 : f32 to vector<1x4x256xf32>
    %4 = arith.mulf %3, %2 : vector<1x4x256xf32>
    %c0_3 = arith.constant 0 : index
    %c0_4 = arith.constant 0 : index
    %c0_5 = arith.constant 0 : index
    %5 = vector.load %arg4[%c0_3, %c0_4, %c0_5] : memref<1x4x256xf32, #tpu.memory_space<vmem>>, vector<1x4x256xf32>
    %6 = vector.broadcast %1 : f32 to vector<1x4x256xf32>
    %7 = arith.mulf %6, %5 : vector<1x4x256xf32>
    %8 = arith.addf %4, %7 : vector<1x4x256xf32>
    %c0_6 = arith.constant 0 : index
    %c0_7 = arith.constant 0 : index
    %c0_8 = arith.constant 0 : index
    %9 = vector.load %arg5[%c0_6, %c0_7, %c0_8] : memref<1x4x256xf32, #tpu.memory_space<vmem>>, vector<1x4x256xf32>
    tpu.vector_store %arg5[%c0_6, %c0_7, %c0_8], %8 {strides = array<i32>} : memref<1x4x256xf32, #tpu.memory_space<vmem>>, vector<1x4x256xf32>,
    return
  }
  func.func @transform_0(%arg0: i32, %arg1: i32) -> i32 {
    %c0_i32 = arith.constant 0 : i32
    %c0_i32_0 = arith.constant 0 : i32
    return %c0_i32 : i32
  }
  func.func @transform_1(%arg0: i32, %arg1: i32) -> (i32, i32, i32) {
    %c0_i32 = arith.constant 0 : i32
    %c0_i32_0 = arith.constant 0 : i32
    return %arg0, %c0_i32, %arg1 : i32, i32, i32
  }
  func.func @transform_2(%arg0: i32, %arg1: i32) -> (i32, i32, i32) {
    %c2_i32 = arith.constant 2 : i32
    %0 = arith.addi %arg0, %c2_i32 : i32
    %c1_i32 = arith.constant 1 : i32
    %1 = arith.subi %0, %c1_i32 : i32
    %c2_i32_0 = arith.constant 2 : i32
    %c0_i32 = arith.constant 0 : i32
    %2 = arith.cmpi eq, %c2_i32_0, %c0_i32 : i32
    %c1_i32_1 = arith.constant 1 : i32
    %3 = arith.select %2, %c1_i32_1, %c2_i32_0 : i32
    %4 = arith.remsi %1, %3 : i32
    %c0_i32_2 = arith.constant 0 : i32
    %5 = arith.cmpi ne, %4, %c0_i32_2 : i32
    %c0_i32_3 = arith.constant 0 : i32
    %6 = arith.cmpi slt, %4, %c0_i32_3 : i32
    %c0_i32_4 = arith.constant 0 : i32
    %7 = arith.cmpi slt, %3, %c0_i32_4 : i32
    %8 = arith.xori %6, %7 : i1
    %9 = arith.andi %8, %5 : i1
    %10 = arith.addi %4, %3 : i32
    %11 = arith.select %9, %10, %4 : i32
    %c0_i32_5 = arith.constant 0 : i32
    %c0_i32_6 = arith.constant 0 : i32
    return %11, %c0_i32_5, %arg1 : i32, i32, i32
  }
  func.func @transform_3(%arg0: i32, %arg1: i32) -> (i32, i32, i32) {
    %c0_i32 = arith.constant 0 : i32
    %c0_i32_0 = arith.constant 0 : i32
    return %arg0, %c0_i32, %arg1 : i32, i32, i32
  }
}

</mosaic_0001>

<bundles_post_ra>
// kernel: tpu_custom_call.1
= control target key start
LH: loop header
LB: loop body
LE: loop exit
PB: predicated region body
PF: predicated region fallthrough
CT: control target
= control target key end

     0   :  { %s1050_s0 = inlined_call_operand.hbm [shape: f32[2], index: 0, kind: input, shape index: {}]   ;;  %s1051_s1 = inlined_call_operand.hbm [shape: f32[2,4,256], index: 1, kind: input, shape index: {}]   ;;  %s1052_s2 = inlined_call_operand.hbm [shape: f32[2,4,256], index: 2, kind: input, shape index: {}]   ;;  %s1053_s3 = inlined_call_operand.hbm [shape: f32[2,4,256], index: 3, kind: output, shape index: {}]  }
   0x1   :  { %1057 = sst [smem:[#allocation18_spill]] %s1050_s0 }
   0x2   :  { %8 = vsyncpa [#allocation5], 0 }
   0x3   :  { %9 = vsyncpa [#allocation3], 0 }
   0x4   :  { %11 = vsyncpa [#allocation3 + $0x1], 0 }
   0x5   :  { %12 = vsyncpa [#allocation8], 0 }
   0x6   :  { %14 = vsyncpa [#allocation8 + $0x1], 0 }
   0x7   :  { %15 = vsyncpa [#allocation4], 0 }
   0x8   :  { %17 = vsyncpa [#allocation4 + $0x1], 0  ;;  %s819_s12 = smov 0   ;;  %s821_s13 = smov 0  }
   0x9   :  { %s823_s14 = smov 0   ;;  %s825_s15 = smov 0  }
   0xa   :  { %s827_s16 = smov 0   ;;  %s829_s17 = smov 0  }
   0xb   :  { %s831_s18 = smov 0   ;;  %s833_s19 = smov 0  }
   0xc   :  { %s835_s20 = smov 0  }
   0xd LB: > { %1058 = sst [smem:[#allocation14_spill]] %s784_s17  ;;  %s471_s21 = sadd.s32 4294967295, %s796_s20   ;;  %s796_s20 = sphi %s835_s20, %s23_s20   ;;  %s792_s19 = sphi %s833_s19, %s1078_s19   ;;  %s788_s18 = sphi %s831_s18, %s1077_s18   ;;  %s784_s17 = sphi %s829_s17, %s1076_s17   ;;  %s780_s16 = sphi %s827_s16, %s1083_s16   ;;  %s776_s15 = sphi %s825_s15, %s1082_s15   ;;  %s772_s14 = sphi %s823_s14, %s1081_s14   ;;  %s768_s13 = sphi %s821_s13, %s1080_s13   ;;  %s764_s12 = sphi %s819_s12, %s1079_s12  }
   0xe   : > { %1059 = sst [smem:[#allocation15_spill]] %s792_s19  ;;  %p479_p0 = scmp.ge.s32.totalorder %s796_s20, 1 }
   0xf   : > { %p866_p1 = scmp.eq.s32.totalorder %s471_s21, 0  ;;  %p870_p2 = scmp.eq.s32.totalorder %s471_s21, 1 }
  0x10   : > { %p171_p3 = scmp.lt.s32.totalorder %s796_s20, 3  ;;  %s1062_s0 = sld [smem:[#allocation18_spill]] }
  0x11   : > { %s798_s28 = smov [#allocation2]   ;;  %s472_s29 = sadd.s32 4294967294, %s796_s20  }
  0x12   : > { %p878_p4 = pnand %p479_p0, %p171_p3  ;;  %s889_s30 = sadd.s32 1, %s792_s19 }
  0x13   : > { %p37_p8 = scmp.ge.s32.totalorder %s889_s30, 2  ;;  %s65_s4 = sadd.s32 1, %s784_s17 }
  0x14   : > { %p515_p6 = pneg %p878_p4  ;;  %p72_p9 = scmp.ne.s32.totalorder %s784_s17, %s780_s16 }
  0x15   : > { %p73_p10 = scmp.eq.s32.totalorder %s796_s20, 0  ;;  %p78_p12 = scmp.ne.s32.totalorder %s780_s16, %s776_s15 }
  0x16   : > { %s183_s26 = sshll.u32 %s1062_s0, 4  ;;  %p516_p7 = pnand %p515_p6, %p866_p1  ;;  %s184_s26 = int_to_ptr.hbm [resolvable:$true] %s183_s26 }
  0x17   : > { %s897_s5 = scalar_select %p37_p8, 0, %s889_s30  }
  0x18   : > { %518 = dma.hbm_to_smem (!%p516_p7), %s184_s26, 16, %s798_s28, [#allocation5]  }
  0x19   : > { %1064 = sst [smem:[#allocation16_spill]] %s897_s5  ;;  %p901_p11 = por %p73_p10, %p72_p9 }
  0x1a   : > { %s60_s7 = ssub.s32 %s792_s19, %s897_s5  ;;  %p911_p0 = por %p866_p1, %p78_p12 }
  0x1b   : > { %p63_p13 = scmp.eq.s32.totalorder %s60_s7, 0  ;;  %s101_s9 = sadd.s32 1, %s897_s5 }
  0x1c   : > { %p918_p3 = por %p870_p2, %p72_p9  ;;  %s103_s21 = ssub.s32 0, %s101_s9 }
  0x1d   : > { %s923_s11 = scalar_select %p63_p13, %s784_s17, %s65_s4  }
  0x1e   : > { %s476_s24 = smin.u32 %s103_s21, %s101_s9  ;;  %p164_p6 = scmp.eq.s32.totalorder %s472_s29, 1 }
  0x1f   : > { %1068 = sst [smem:[#allocation17_spill]] %s923_s11  ;;  %s105_s25 = sand.u32 1, %s476_s24  }
  0x20   : > { %p531_p7 = scmp.lt.s32.totalorder %s796_s20, 2  ;;  %p926_p8 = por %p164_p6, %p78_p12 }
  0x21   : > { %s194_s23 = sand.u32 1, %s784_s17   ;;  %s502_s28 = sshll.u32 %s792_s19, 3 }
  0x22   : > { %s1069_s26 = scalar_select %p926_p8, 1, 0 }
  0x23   : > { %s482_s4 = sshll.u32 %s194_s23, 3  ;;  %s205_s29 = scalar_lea.hbm %s1051_s1, %s502_s28 }
  0x24   : > { %s207_s9 = sshll.u32 %s205_s29, 4  ;;  %s198_s21 = scalar_lea.vmem [#allocation6], %s482_s4  ;;  %s208_s9 = int_to_ptr.hbm [resolvable:$true] %s207_s9 }
  0x25   : > { %s209_s24 = sshll.u32 %s198_s21, 4  ;;  %p520_p2 = pnand %p531_p7, %p901_p11  ;;  %s210_s24 = int_to_ptr.vmem [resolvable:$true] %s209_s24 }
  0x26   : > { %s195_s5 = scalar_lea.sflag [#allocation3], %s194_s23  ;;  %s90_s19 = ssub.s32 0, %s889_s30 }
  0x27   : > { %522 = dma.hbm_to_vmem [thread:$0]  (!%p520_p2), %s208_s9, 128, %s210_s24, %s195_s5  }
  0x28   : > { %s119_s11 = sadd.s32 1, %s772_s14  ;;  %s473_s17 = smin.u32 %s90_s19, %s889_s30 }
  0x29   : > { %p126_p9 = scmp.ne.s32.totalorder %s772_s14, %s768_s13  ;;  %s92_s0 = sand.u32 1, %s473_s17  }
  0x2a   : > { %p132_p12 = scmp.ne.s32.totalorder %s768_s13, %s764_s12  ;;  %p475_p6 = scmp.lt.s32.totalorder %s92_s0, 0 }
  0x2b   : > { %p948_p13 = por %p126_p9, %p73_p10  ;;  %s99_s6 = sadd.s32 2, %s92_s0 }
  0x2c   : > { %p478_p5 = scmp.lt.s32.totalorder %s105_s25, 0  ;;  %s112_s4 = sadd.s32 2, %s105_s25 }
  0x2d   : > { %s1085_s6 = smov (!%p475_p6, %s99_s6), %s92_s0  ;;  %p954_p11 = por %p132_p12, %p866_p1 }
  0x2e   : > { %s1087_s4 = smov (!%p478_p5, %s112_s4), %s105_s25  ;;  %s216_s17 = sand.u32 1, %s772_s14  }
  0x2f   : > { %s114_s12 = ssub.s32 %s1085_s6, %s1087_s4  ;;  %s485_s30 = sshll.u32 %s216_s17, 3 }
  0x30   : > { %p117_p2 = scmp.eq.s32.totalorder %s114_s12, 0  ;;  %s503_s5 = sshll.u32 %s1085_s6, 3 }
  0x31   : > { %s240_s9 = scalar_lea.hbm %s1052_s2, %s503_s5  ;;  %s220_s21 = scalar_lea.vmem [#allocation7], %s485_s30 }
  0x32   : > { %s960_s23 = scalar_select %p117_p2, %s772_s14, %s119_s11  }
  0x33   : > { %s244_s24 = sshll.u32 %s220_s21, 4  ;;  %s242_s0 = sshll.u32 %s240_s9, 4  ;;  %s245_s24 = int_to_ptr.vmem [resolvable:$true] %s244_s24  ;;  %s243_s0 = int_to_ptr.hbm [resolvable:$true] %s242_s0 }
  0x34   : > { %p969_p5 = pnand %p531_p7, %p948_p13  ;;  %s217_s4 = scalar_lea.sflag [#allocation8], %s216_s17 }
  0x35   : > { %s652_s6 = sshra.s32 %s243_s0, 4  ;;  %s659_s5 = scalar_lea.hbm %s1052_s2, 16  ;;  %s653_s6 = int_to_ptr.hbm [resolvable:$true] %s652_s6 }
  0x36   : > { %s654_s11 = scalar_lea.hbm %s653_s6, 8  ;;  %p656_p9 = pneg %p969_p5 }
  0x37   : > { %p655_p10 = scmp.ne.s32.totalorder %s653_s6, %s654_s11  ;;  %p660_p7 = scmp.lt.s32.totalorder %s653_s6, %s1052_s2 }
  0x38   : > { %p661_p13 = scmp.lt.s32.totalorder %s659_s5, %s654_s11 }
  0x39   : > { %p657_p12 = pnand %p656_p9, %p655_p10 }
  0x3a   : > { %p662_p2 = por %p661_p13, %p660_p7 }
  0x3b   : > { %p658_p6 = pneg %p657_p12 }
  0x3d   : > { %p663_p8 = pnand %p662_p2, %p658_p6 }
  0x3f   : > { %666 = shalt.err (!%p663_p8)
}
  0x40   : > { %525 = dma.hbm_to_vmem [thread:$0]  (!%p969_p5), %s243_s0, 128, %s245_s24, %s217_s4  }
  0x41   : > { %253 = sbr.rel (%p878_p4) target bundleno = 97 (0x61), region = 32 }
  0x46   : > { %747 = dma.done.wait (%p866_p1), [#allocation5], 16  }
  0x47   : > { %749 = vsyncadd (%p866_p1), [#allocation5], 4294967280  ;;  %s990_s17 = sand.u32 1, %s780_s16  }
  0x48   : > { %s493_s29 = sshll.u32 %s990_s17, 3  ;;  %s261_s9 = scalar_lea.sflag [#allocation3], %s990_s17 }
  0x49   : > { %s264_s21 = scalar_lea.vmem [#allocation6], %s493_s29 }
  0x4a   : > { %751 = dma.done.wait (%p911_p0), %s261_s9, 128  }
  0x4b   : > { %753 = vsyncadd (%p911_p0), %s261_s9, 4294967168  ;;  %s270_s27 = sand.u32 1, %s768_s13  }
  0x4c   : > { %s494_s24 = sshll.u32 %s270_s27, 3  ;;  %s271_s22 = scalar_lea.sflag [#allocation8], %s270_s27 }
  0x4d   : > { %s274_s0 = scalar_lea.vmem [#allocation7], %s494_s24 }
  0x4e   : > { %755 = dma.done.wait (%p954_p11), %s271_s22, 128  }
  0x4f   : > { %757 = vsyncadd (%p954_p11), %s271_s22, 4294967168 }
  0x50   : > { %280 = sfence }
  0x51   : > { %s320_s25 = sld [smem:[#allocation2]]  ;;  %s504_s6 = sshll.u32 %s788_s18, 3  ;;  %v322_v0 = vld [vmem:[%s264_s21] sm:$0xff]  ;;  %v325_v1 = vld [vmem:[%s274_s0] sm:$0xff] }
  0x52   : > { %s496_s4 = sld [smem:[#allocation2 + $0x1]]  ;;  %s344_s12 = scalar_lea.hbm %s1053_s3, %s504_s6 }
  0x53   : > { %s303_s30 = scalar_lea.vmem [#allocation9], %s493_s29  ;;  %s348_s19 = sshll.u32 %s344_s12, 4  ;;  %s349_s19 = int_to_ptr.hbm [resolvable:$true] %s348_s19 }
  0x54   : > { %s346_s5 = sshll.u32 %s303_s30, 4  ;;  %s331_s28 = scalar_lea.sflag [#allocation4], %s990_s17  ;;  %s347_s5 = int_to_ptr.vmem [resolvable:$true] %s346_s5 }
  0x55   : > { %s696_s18 = sshra.s32 %s349_s19, 4  ;;  %s702_s29 = scalar_lea.hbm %s1053_s3, 16  ;;  %s697_s18 = int_to_ptr.hbm [resolvable:$true] %s696_s18 }
  0x56   : > { %s698_s7 = scalar_lea.hbm %s697_s18, 8  ;;  %p703_p8 = scmp.lt.s32.totalorder %s697_s18, %s1053_s3 }
  0x57   : > { %v323_v2 = vstv %s320_s25  ;;  %p699_p1 = scmp.ne.s32.totalorder %s697_s18, %s698_s7  ;;  %p704_p11 = scmp.lt.s32.totalorder %s702_s29, %s698_s7 }
  0x58   : > { %v324_v3 = vmul.f32 %v323_v2, %v322_v0  ;;  %v326_v4 = vstv %s496_s4 }
  0x59   : > { %v327_v5 = vmul.f32 %v326_v4, %v325_v1  ;;  %p700_p4 = pnand %p699_p1, %p918_p3  ;;  %p705_p5 = por %p704_p11, %p703_p8 }
  0x5b   : > { %v328_v6 = vadd.f32 %v327_v5, %v324_v3  ;;  %p701_p0 = pneg %p700_p4 }
  0x5d   : > { %329 = vst [vmem:[%s303_s30] sm:$0xff] %v328_v6  ;;  %p706_p10 = pnand %p705_p5, %p701_p0 }
  0x5f   : > { %709 = shalt.err (!%p706_p10)
}
  0x60   : > { %513 = dma.vmem_to_hbm [thread:$0]  (%p918_p3), %s347_s5, 128, %s349_s19, %s331_s28  }
  0x61 PF: > { %s360_s17 = sand.u32 1, %s776_s15   ;;  %p1073_p9 = scmp.ne.s32.totalorder %s1069_s26, 0 }
  0x62   : > { %p1074_p12 = scmp.ge.s32.totalorder %s796_s20, 2  ;;  %s361_s22 = scalar_lea.sflag [#allocation4], %s360_s17 }
  0x64   : > { %p527_p6 = pnand %p1074_p12, %p1073_p9 }
  0x66   : > { %p528_p7 = pneg %p527_p6 }
  0x68   : > { %759 = dma.done.wait (%p528_p7), %s361_s22, 128  }
  0x69   : > { %761 = vsyncadd (%p528_p7), %s361_s22, 4294967168  ;;  %s23_s20 = sadd.s32 1, %s796_s20   ;;  %s1075_s10 = sld [smem:[#allocation14_spill]] }
  0x6a   : > { %p20_p13 = scmp.ge.s32.totalorder %s23_s20, 4   ;;  %s1076_s17 = sld [smem:[#allocation17_spill]] }
  0x6b   : > { %s1077_s18 = sld [smem:[#allocation15_spill]]  ;;  %s1079_s12 = smov %s768_s13 }
  0x6c   : > { %s1078_s19 = sld [smem:[#allocation16_spill]]  ;;  %s1080_s13 = smov %s772_s14 }
  0x6d   : > { %s1081_s14 = smov %s960_s23  ;;  %s1082_s15 = smov %s780_s16 }
  0x6e   :  { %22 = sbr.rel (!%p20_p13) target bundleno = 13 (0xd), region = 95 }
  0x6f   : > { %s1083_s16 = smov %s1075_s10 }
  0x73   :  { %367 = vsyncpa [#allocation3], 1 }
  0x74   :  { %369 = vsyncpa [#allocation3 + $0x1], 1 }
  0x75   :  { %370 = vsyncpa [#allocation8], 1 }
  0x76   :  { %372 = vsyncpa [#allocation8 + $0x1], 1 }
  0x77   :  { %373 = vsyncpa [#allocation4], 1 }
  0x78   :  { %375 = vsyncpa [#allocation4 + $0x1], 1 }
  0x79   :  { %376 = vsyncpa [#allocation5], 1 }
  0x7a   :  { %378 = vsyncpa [#allocation5 + $0x1], 1 }

</bundles_post_ra>
